<compile_context>
chip_gen: v7x
topology: tpu7x:2x2x1
jax: 0.10.0
libtpu: 0.0.40
codegen_flags: <defaults>
</compile_context>

<pallas_src>
import math

import numpy as np

import jax
import jax.numpy as jnp
from jax import lax
from jax.experimental import pallas as pl
from jax.experimental.pallas import tpu as pltpu


# ----------------------------------------------------------------------------
# Plain-JAX glue: sampling / grouping (data-dependent gathers & sort)
# TODO(synk): FPS (sequential argmax loop) and ball-query sort/gather have no
#             clean Pallas equivalent at these shapes; kept as JAX glue.
# ----------------------------------------------------------------------------
def index_points(points, idx):
    """points: [B, N, C], idx: [B, ...] int -> [B, ..., C]"""
    return jax.vmap(lambda p, i: p[i])(points, idx)


def square_distance(src, dst):
    """src: [B, N, C], dst: [B, M, C] -> [B, N, M]"""
    dist = -2.0 * jnp.einsum("bnc,bmc->bnm", src, dst)
    dist = dist + jnp.sum(src ** 2, axis=-1)[:, :, None]
    dist = dist + jnp.sum(dst ** 2, axis=-1)[:, None, :]
    return dist


def farthest_point_sample(xyz, npoint, key):
    """xyz: [B, N, 3] -> centroids: [B, npoint] int32.
    (torch uses torch.randint for the start point; here a deterministic
    jax.random.randint with a fixed key is used — same FPS semantics.)"""
    B, N, _ = xyz.shape
    farthest0 = jax.random.randint(key, (B,), 0, N).astype(jnp.int32)
    distance0 = jnp.full((B, N), 1e10, dtype=jnp.float32)
    centroids0 = jnp.zeros((B, npoint), dtype=jnp.int32)

    def body(i, carry):
        centroids, distance, farthest = carry
        centroids = centroids.at[:, i].set(farthest)
        centroid = index_points(xyz, farthest[:, None])           # [B, 1, 3]
        dist = jnp.sum((xyz - centroid) ** 2, axis=-1)            # [B, N]
        distance = jnp.where(dist < distance, dist, distance)
        farthest = jnp.argmax(distance, axis=-1).astype(jnp.int32)
        return centroids, distance, farthest

    centroids, _, _ = lax.fori_loop(
        0, npoint, body, (centroids0, distance0, farthest0))
    return centroids


def query_ball_point(radius, nsample, xyz, new_xyz):
    """xyz: [B, N, 3], new_xyz: [B, S, 3] -> group_idx [B, S, nsample] int32"""
    B, N, _ = xyz.shape
    S = new_xyz.shape[1]
    group_idx = jnp.broadcast_to(jnp.arange(N, dtype=jnp.int32), (B, S, N))
    sqrdists = square_distance(new_xyz, xyz)
    group_idx = jnp.where(sqrdists > radius ** 2, jnp.int32(N), group_idx)
    group_idx = jnp.sort(group_idx, axis=-1)[:, :, :nsample]
    group_first = jnp.repeat(group_idx[:, :, :1], nsample, axis=-1)
    group_idx = jnp.where(group_idx == N, group_first, group_idx)
    return group_idx


def sample_and_group(npoint, radius, nsample, xyz, points, key):
    B, N, C = xyz.shape
    fps_idx = farthest_point_sample(xyz, npoint, key)             # [B, S]
    new_xyz = index_points(xyz, fps_idx)                          # [B, S, 3]
    idx = query_ball_point(radius, nsample, xyz, new_xyz)         # [B, S, K]
    grouped_xyz = index_points(xyz, idx)                          # [B, S, K, 3]
    grouped_xyz_norm = grouped_xyz - new_xyz[:, :, None, :]
    if points is not None:
        grouped_points = index_points(points, idx)                # [B, S, K, D]
        new_points = jnp.concatenate([grouped_xyz_norm, grouped_points], axis=-1)
    else:
        new_points = grouped_xyz_norm
    return new_xyz, new_points


def sample_and_group_all(xyz, points):
    B, N, C = xyz.shape
    new_xyz = jnp.zeros((B, 1, C), dtype=xyz.dtype)
    grouped_xyz = xyz[:, None, :, :]
    if points is not None:
        new_points = jnp.concatenate([grouped_xyz, points[:, None, :, :]], axis=-1)
    else:
        new_points = grouped_xyz
    return new_xyz, new_points


# ----------------------------------------------------------------------------
# Small helpers: padding, tile selection, per-generation VMEM sizing
# ----------------------------------------------------------------------------
def _round_up(x, m):
    return ((x + m - 1) // m) * m


def _vmem_capacity_bytes():
    try:
        return int(pltpu.get_tpu_info().vmem_capacity_bytes)
    except Exception:
        return 64 << 20                      # conservative fallback (v7x-sized)


def _largest_divisor_tile(total, cap, quantum=16):
    """Largest multiple-of-`quantum` divisor of `total` that is <= cap."""
    cap = int(min(cap, total))
    cap -= cap % quantum
    cap = max(cap, quantum)
    d = cap
    while d > quantum:
        if total % d == 0:
            return d
        d -= quantum
    return quantum


def _pick_row_tile(rows, cin, cout, mxu_bytes, budget):
    # double-buffered bf16 in/out blocks + in-kernel f32 temporaries (h, y)
    per_row = 2 * (cin + cout) * mxu_bytes + 4 * (cin + 2 * cout)
    cap = max(16, budget // max(per_row, 1))
    cap = min(cap, 2048)
    return _largest_divisor_tile(rows, cap, 16)


def _pick_g_tile(G, cin, cout, mxu_bytes, budget):
    # last fused pass: (1, tg, cin) bf16 double-buffered in, (tg, cout) f32
    # resident max + f32 temporaries.
    per_g = 2 * cin * mxu_bytes + 4 * cout + 4 * (cin + 2 * cout)
    cap = max(16, budget // max(per_g, 1))
    cap = min(cap, 1024)
    cap -= cap % 16
    cap = max(cap, 16)
    tg = min(_round_up(G, 16), cap)
    n_tiles = -(-G // tg)
    tg = _round_up(-(-G // n_tiles), 16)     # rebalance: keep padding small
    return tg


# ----------------------------------------------------------------------------
# Pallas kernels
# ----------------------------------------------------------------------------
def _partial_stats(y):
    """Per-tile per-channel [sum; sum-of-squares] of an f32 (rows, C) tile."""
    return jnp.concatenate([jnp.sum(y, axis=0, keepdims=True),
                            jnp.sum(y * y, axis=0, keepdims=True)], axis=0)


def _conv_stats_kernel(x_ref, w_ref, y_ref, stats_ref):
    """Layer 0: 1x1 conv (MXU matmul) + per-tile BN sum/sumsq partials."""
    y = jnp.dot(x_ref[...], w_ref[...], preferred_element_type=jnp.float32)
    y_ref[...] = y.astype(y_ref.dtype)
    stats_ref[0] = _partial_stats(y)


def _make_bn_relu_conv_stats_kernel(mxu_dtype):
    """Layer 1..L-2: BN-apply(i-1)+ReLU fused with conv(i) + per-tile stats."""

    def kernel(y_prev_ref, ac_ref, w_ref, y_ref, stats_ref):
        a = ac_ref[0:1, :]                   # folded scale  g*rsqrt(var+eps)
        c = ac_ref[1:2, :]                   # folded shift  beta - mean*a
        h = jnp.maximum(y_prev_ref[...].astype(jnp.float32) * a + c, 0.0)
        y = jnp.dot(h.astype(mxu_dtype), w_ref[...],
                    preferred_element_type=jnp.float32)
        y_ref[...] = y.astype(y_ref.dtype)
        stats_ref[0] = _partial_stats(y)

    return kernel


def _make_last_fused_kernel(mxu_dtype, apply_bn):
    """Last layer: [BN-apply(L-2)+ReLU] + conv(L-1) + per-tile stats + running
    max over the nsample (K) grid axis.  BN(L-1)+ReLU of the max is applied in
    the wrapper (valid: folded BN scale is non-negative, ReLU is monotone)."""

    def body(x_block, ac_ref, w_ref, max_ref, stats_ref):
        if apply_bn:
            a = ac_ref[0:1, :]
            c = ac_ref[1:2, :]
            h = jnp.maximum(x_block.astype(jnp.float32) * a + c, 0.0)
            lhs = h.astype(mxu_dtype)
        else:
            lhs = x_block
        y = jnp.dot(lhs, w_ref[...], preferred_element_type=jnp.float32)
        st = _partial_stats(y)
        k = pl.program_id(1)

        @pl.when(k == 0)
        def _():
            max_ref[...] = y
            stats_ref[0] = st

        @pl.when(k != 0)
        def _():
            max_ref[...] = jnp.maximum(max_ref[...], y)
            stats_ref[0] = stats_ref[0] + st

    if apply_bn:
        def kernel(y_prev_ref, ac_ref, w_ref, max_ref, stats_ref):
            body(y_prev_ref[0], ac_ref, w_ref, max_ref, stats_ref)
    else:
        def kernel(x_ref, w_ref, max_ref, stats_ref):
            body(x_ref[0], None, w_ref, max_ref, stats_ref)
    return kernel


# ----------------------------------------------------------------------------
# Module
# ----------------------------------------------------------------------------
class PointNetSetAbstractionPallas:
    def __init__(self, npoint, radius, nsample, in_channel, mlp, group_all, key,
                 mxu_dtype=jnp.bfloat16, eps=1e-5):
        self.npoint = npoint
        self.radius = radius
        self.nsample = nsample
        self.group_all = group_all
        self.mlp = list(mlp)
        self.in_channel = in_channel
        self.eps = eps
        self.mxu_dtype = mxu_dtype

        # hoisted device queries / VMEM sizing (trace-time only)
        self.vmem_cap = _vmem_capacity_bytes()
        self.act_budget = max(4 << 20, self.vmem_cap // 4)
        self.vmem_limit = int(min(self.vmem_cap * 3 // 4, 100 << 20))

        # channel dims kept near their true width (16-aligned for bf16 tiling)
        self.cin_p = [_round_up(in_channel, 16)] + \
                     [_round_up(c, 16) for c in mlp[:-1]]
        self.cout_p = [_round_up(c, 16) for c in mlp]

        # NOTE: the Conv2d bias is intentionally dropped — train-mode BatchNorm
        # subtracts the per-channel batch mean, which cancels the bias exactly.
        self.weights = []    # padded (Cin_p, Cout_p) in matmul dtype
        self.gammas_p = []   # (Cout_p,) f32 ones  (BatchNorm2d default weight)
        self.betas_p = []    # (Cout_p,) f32 zeros (BatchNorm2d default bias)
        last = in_channel
        keys = jax.random.split(key, len(mlp))
        for i, out_c in enumerate(mlp):
            bound = 1.0 / math.sqrt(last)
            w = jax.random.uniform(keys[i], (last, out_c), jnp.float32,
                                   minval=-bound, maxval=bound)
            w_pad = jnp.zeros((self.cin_p[i], self.cout_p[i]), jnp.float32)
            w_pad = w_pad.at[:last, :out_c].set(w)
            self.weights.append(w_pad.astype(self.mxu_dtype))
            self.gammas_p.append(jnp.ones((self.cout_p[i],), jnp.float32))
            self.betas_p.append(jnp.zeros((self.cout_p[i],), jnp.float32))
            last = out_c

        # The max-before-BN fusion in the last layer requires a non-negative
        # folded scale, i.e. gamma >= 0 on the last layer (true for default BN).
        assert bool(jnp.all(self.gammas_p[-1] >= 0)), \
            "max-before-BN fusion requires non-negative gamma on the last layer"

    # ---------------- BN fold ----------------
    def _fold_bn(self, stats_sum, i, count):
        """stats_sum: (2, Cp) [sum; sumsq] -> folded (2, Cp) [scale; shift]."""
        mean = stats_sum[0] / count
        var = jnp.maximum(stats_sum[1] / count - mean * mean, 0.0)
        a = self.gammas_p[i] * lax.rsqrt(var + self.eps)
        c = self.betas_p[i] - mean * a
        return jnp.stack([a, c], axis=0)

    # ---------------- pallas_call wrappers ----------------
    def _compiler_params(self, semantics):
        return pltpu.CompilerParams(dimension_semantics=semantics,
                                    vmem_limit_bytes=self.vmem_limit)

    def _conv_stats_pass(self, x2d, w, tile_rows):
        rows, cin = x2d.shape
        cout = w.shape[1]
        nt = rows // tile_rows
        return pl.pallas_call(
            _conv_stats_kernel,
            grid=(nt,),
            in_specs=[pl.BlockSpec((tile_rows, cin), lambda i: (i, 0)),
                      pl.BlockSpec((cin, cout), lambda i: (0, 0))],
            out_specs=(pl.BlockSpec((tile_rows, cout), lambda i: (i, 0)),
                       pl.BlockSpec((1, 2, cout), lambda i: (i, 0, 0))),
            out_shape=(jax.ShapeDtypeStruct((rows, cout), self.mxu_dtype),
                       jax.ShapeDtypeStruct((nt, 2, cout), jnp.float32)),
            compiler_params=self._compiler_params(("parallel",)),
        )(x2d, w)

    def _mid_pass(self, y_prev, ac, w, tile_rows):
        rows, cin = y_prev.shape
        cout = w.shape[1]
        nt = rows // tile_rows
        kernel = _make_bn_relu_conv_stats_kernel(self.mxu_dtype)
        return pl.pallas_call(
            kernel,
            grid=(nt,),
            in_specs=[pl.BlockSpec((tile_rows, cin), lambda i: (i, 0)),
                      pl.BlockSpec((2, cin), lambda i: (0, 0)),
                      pl.BlockSpec((cin, cout), lambda i: (0, 0))],
            out_specs=(pl.BlockSpec((tile_rows, cout), lambda i: (i, 0)),
                       pl.BlockSpec((1, 2, cout), lambda i: (i, 0, 0))),
            out_shape=(jax.ShapeDtypeStruct((rows, cout), self.mxu_dtype),
                       jax.ShapeDtypeStruct((nt, 2, cout), jnp.float32)),
            compiler_params=self._compiler_params(("parallel",)),
        )(y_prev, ac, w)

    def _last_pass(self, x3d, ac, w, tile_g, apply_bn):
        K, Gp, cin = x3d.shape
        cout = w.shape[1]
        gt = Gp // tile_g
        kernel = _make_last_fused_kernel(self.mxu_dtype, apply_bn)
        in_specs = [pl.BlockSpec((1, tile_g, cin), lambda j, k: (k, j, 0))]
        operands = [x3d]
        if apply_bn:
            in_specs.append(pl.BlockSpec((2, cin), lambda j, k: (0, 0)))
            operands.append(ac)
        in_specs.append(pl.BlockSpec((cin, cout), lambda j, k: (0, 0)))
        operands.append(w)
        return pl.pallas_call(
            kernel,
            grid=(gt, K),
            in_specs=in_specs,
            out_specs=(pl.BlockSpec((tile_g, cout), lambda j, k: (j, 0)),
                       pl.BlockSpec((1, 2, cout), lambda j, k: (j, 0, 0))),
            out_shape=(jax.ShapeDtypeStruct((Gp, cout), jnp.float32),
                       jax.ShapeDtypeStruct((gt, 2, cout), jnp.float32)),
            compiler_params=self._compiler_params(("parallel", "arbitrary")),
        )(*operands)

    # ---------------- forward ----------------
    def forward(self, xyz, points, fps_key):
        """xyz: [B, 3, N], points: [B, D, N] -> ([B, 3, S], [B, mlp[-1], S])"""
        xyz_t = jnp.transpose(xyz, (0, 2, 1))                     # [B, N, 3]
        points_t = (jnp.transpose(points, (0, 2, 1))
                    if points is not None else None)              # [B, N, D]

        if self.group_all:
            new_xyz, new_points = sample_and_group_all(xyz_t, points_t)
        else:
            new_xyz, new_points = sample_and_group(
                self.npoint, self.radius, self.nsample, xyz_t, points_t, fps_key)

        B, S, K, Cin = new_points.shape
        G = B * S
        nlayers = len(self.mlp)
        cin0_p = self.cin_p[0]
        mxu = self.mxu_dtype
        mxu_bytes = np.dtype(mxu).itemsize

        # g-tile for the fused last pass determines Gp (group padding)
        tg = _pick_g_tile(G, self.cin_p[-1], self.cout_p[-1],
                          mxu_bytes, self.act_budget)
        Gp = _round_up(G, tg)
        rows = K * Gp
        count = jnp.float32(K * G)           # real rows per channel for BN stats
        n_pad = K * (Gp - G)

        # canonical (k, g) layout: the max over nsample becomes a running max
        # of K contiguous (Gp, C) slabs inside the last pass (pure VPU).
        x = jnp.transpose(new_points, (2, 0, 1, 3)).reshape(K, G, Cin)
        x = jnp.pad(x, ((0, 0), (0, Gp - G), (0, cin0_p - Cin))).astype(mxu)

        if nlayers == 1:
            # padded rows of x are exactly zero -> zero stats contribution
            maxed, stats = self._last_pass(x, None, self.weights[0], tg,
                                           apply_bn=False)
            ac = self._fold_bn(jnp.sum(stats, axis=0), 0, count)
        else:
            x2d = x.reshape(rows, cin0_p)

            # layer 0: conv matmul + per-tile batch sum/sumsq
            tr = _pick_row_tile(rows, cin0_p, self.cout_p[0],
                                mxu_bytes, self.act_budget)
            y, stats = self._conv_stats_pass(x2d, self.weights[0], tr)
            ac = self._fold_bn(jnp.sum(stats, axis=0), 0, count)
            # padded-group rows of x are zero -> their conv output is exactly 0
            pad_y = jnp.zeros((self.cout_p[0],), jnp.float32)

            for i in range(1, nlayers):
                # every padded-group row carries the identical activation, so
                # its stats contribution is tracked/corrected in the wrapper
                # (no in-kernel mask, no HBM mask stream).
                pad_h = jnp.maximum(
                    pad_y.astype(mxu).astype(jnp.float32) * ac[0] + ac[1], 0.0)
                pad_y = jnp.dot(pad_h.astype(mxu)[None, :], self.weights[i],
                                preferred_element_type=jnp.float32)[0]

                if i == nlayers - 1:
                    # last layer: conv + stats + running max over nsample fused
                    y3 = y.reshape(K, Gp, self.cin_p[i])
                    maxed, stats = self._last_pass(y3, ac, self.weights[i], tg,
                                                   apply_bn=True)
                else:
                    tr = _pick_row_tile(rows, self.cin_p[i], self.cout_p[i],
                                        mxu_bytes, self.act_budget)
                    y, stats = self._mid_pass(y, ac, self.weights[i], tr)

                stats_sum = jnp.sum(stats, axis=0)
                if n_pad:
                    stats_sum = stats_sum - jnp.float32(n_pad) * jnp.stack(
                        [pad_y, pad_y * pad_y], axis=0)
                ac = self._fold_bn(stats_sum, i, count)

        # final BN + ReLU of the per-group max (tiny (Gp, Cout) op; valid
        # because the folded BN scale is non-negative and ReLU is monotone).
        out = jnp.maximum(maxed * ac[0:1, :] + ac[1:2, :], 0.0)

        C_last = self.mlp[-1]
        new_points_out = out[:G, :C_last].reshape(B, S, C_last).transpose(0, 2, 1)
        new_xyz_out = new_xyz.transpose(0, 2, 1)                  # [B, 3, S]
        return new_xyz_out, new_points_out


# ----------------------------------------------------------------------------
# Pure-jnp reference (identical math/quantization) for a runtime sanity check
# ----------------------------------------------------------------------------
def _reference_forward(sa, xyz, points, fps_key):
    xyz_t = jnp.transpose(xyz, (0, 2, 1))
    points_t = jnp.transpose(points, (0, 2, 1)) if points is not None else None
    if sa.group_all:
        new_xyz, new_points = sample_and_group_all(xyz_t, points_t)
    else:
        new_xyz, new_points = sample_and_group(
            sa.npoint, sa.radius, sa.nsample, xyz_t, points_t, fps_key)
    B, S, K, Cin = new_points.shape
    x = new_points.reshape(B * S * K, Cin)
    h = jnp.pad(x, ((0, 0), (0, sa.cin_p[0] - Cin))).astype(sa.mxu_dtype)
    count = jnp.float32(B * S * K)
    nlayers = len(sa.mlp)
    y = a = c = None
    for i in range(nlayers):
        y = jnp.dot(h, sa.weights[i], preferred_element_type=jnp.float32)
        mean = jnp.sum(y, axis=0) / count
        var = jnp.maximum(jnp.sum(y * y, axis=0) / count - mean * mean, 0.0)
        a = sa.gammas_p[i] * lax.rsqrt(var + sa.eps)
        c = sa.betas_p[i] - mean * a
        if i < nlayers - 1:
            yq = y.astype(sa.mxu_dtype).astype(jnp.float32)   # bf16 storage
            h = jnp.maximum(yq * a + c, 0.0).astype(sa.mxu_dtype)
    ymax = jnp.max(y.reshape(B, S, K, sa.cout_p[-1]), axis=2)
    feat = jnp.maximum(ymax * a + c, 0.0)[:, :, :sa.mlp[-1]]
    return new_xyz.transpose(0, 2, 1), feat.transpose(0, 2, 1)


# ----------------------------------------------------------------------------
if __name__ == "__main__":
    key = jax.random.PRNGKey(0)
    k_xyz, k_pts, k_param, k_fps = jax.random.split(key, 4)

    B, N, D = 2, 16, 4
    # npoint=10 -> B*S=20 (not tile-aligned) so the padded-group stats
    # correction path is exercised as well.
    npoint, radius, nsample = 10, 0.4, 8
    mlp = [8, 16, 32]

    xyz = jax.random.uniform(k_xyz, (B, 3, N), dtype=jnp.float32)
    points = jax.random.normal(k_pts, (B, D, N), dtype=jnp.float32)

    sa = PointNetSetAbstractionPallas(
        npoint=npoint, radius=radius, nsample=nsample,
        in_channel=3 + D, mlp=mlp, group_all=False, key=k_param)

    new_xyz, new_feat = sa.forward(xyz, points, fps_key=k_fps)
    jax.block_until_ready((new_xyz, new_feat))

    assert new_xyz.shape == (B, 3, npoint), new_xyz.shape
    assert new_feat.shape == (B, mlp[-1], npoint), new_feat.shape
    assert bool(jnp.all(jnp.isfinite(new_feat)))

    # sanity check against a pure-jnp reference with identical math
    ref_xyz, ref_feat = _reference_forward(sa, xyz, points, k_fps)
    assert bool(jnp.allclose(new_xyz, ref_xyz))
    err = float(jnp.max(jnp.abs(new_feat - ref_feat)))
    assert err < 3e-2, f"max abs diff vs reference: {err}"

    print("KERNEL_OK")
</pallas_src>

<mosaic_0001>
module attributes {stable_mosaic.version = 11 : i64} {
  func.func @_conv_stats_kernel(%arg0: i32, %arg1: memref<256x16xbf16, #tpu.memory_space<vmem>>, %arg2: memref<16x16xbf16, #tpu.memory_space<vmem>>, %arg3: memref<256x16xbf16, #tpu.memory_space<vmem>>, %arg4: memref<1x2x16xf32, #tpu.memory_space<vmem>>) attributes {dimension_semantics = [#tpu.dimension_semantics<parallel>], iteration_bounds = array<i64: 1>, scalar_prefetch = 0 : i64, scratch_operands = 0 : i64, tpu.core_type = #tpu.core_type<tc>, window_params = [{transform_indices = @transform_0, window_bounds = array<i64: 256, 16>}, {pipeline_mode = #tpu.pipeline_mode<synchronous>, transform_indices = @transform_1, window_bounds = array<i64: 16, 16>}, {transform_indices = @transform_2, window_bounds = array<i64: 256, 16>}, {transform_indices = @transform_3, window_bounds = array<i64: 1, 2, 16>}]} {
    %c0 = arith.constant 0 : index
    %c0_0 = arith.constant 0 : index
    %0 = vector.load %arg1[%c0, %c0_0] : memref<256x16xbf16, #tpu.memory_space<vmem>>, vector<256x16xbf16>
    %c0_1 = arith.constant 0 : index
    %c0_2 = arith.constant 0 : index
    %1 = vector.load %arg2[%c0_1, %c0_2] : memref<16x16xbf16, #tpu.memory_space<vmem>>, vector<16x16xbf16>
    %cst = arith.constant dense<0.000000e+00> : vector<256x16xf32>
    %2 = tpu.matmul %0, %1, %cst {dimension_numbers = #tpu.dot_dimension_numbers<[1], [0], [0], [1], [0, 0, 1, 1], [], []>} : vector<256x16xbf16>, vector<16x16xbf16>, vector<256x16xf32> -> vector<256x16xf32>
    %3 = arith.truncf %2 : vector<256x16xf32> to vector<256x16xbf16>
    %c0_3 = arith.constant 0 : index
    %c0_4 = arith.constant 0 : index
    %4 = vector.load %arg3[%c0_3, %c0_4] : memref<256x16xbf16, #tpu.memory_space<vmem>>, vector<256x16xbf16>
    tpu.vector_store %arg3[%c0_3, %c0_4], %3 {strides = array<i32>} : memref<256x16xbf16, #tpu.memory_space<vmem>>, vector<256x16xbf16>,
    %cst_5 = arith.constant dense<0.000000e+00> : vector<16xf32>
    %5 = vector.multi_reduction <add>, %2, %cst_5 [0] : vector<256x16xf32> to vector<16xf32>
    %6 = vector.shape_cast %5 : vector<16xf32> to vector<1x16xf32>
    %7 = arith.mulf %2, %2 : vector<256x16xf32>
    %cst_6 = arith.constant dense<0.000000e+00> : vector<16xf32>
    %8 = vector.multi_reduction <add>, %7, %cst_6 [0] : vector<256x16xf32> to vector<16xf32>
    %9 = vector.shape_cast %8 : vector<16xf32> to vector<1x16xf32>
    %10 = tpu.concatenate %6, %9 in 0 : vector<1x16xf32>, vector<1x16xf32> -> vector<2x16xf32>
    %c0_7 = arith.constant 0 : index
    %c0_8 = arith.constant 0 : index
    %c0_9 = arith.constant 0 : index
    %11 = vector.load %arg4[%c0_7, %c0_8, %c0_9] : memref<1x2x16xf32, #tpu.memory_space<vmem>>, vector<1x2x16xf32>
    %12 = vector.shape_cast %11 : vector<1x2x16xf32> to vector<2x16xf32>
    %13 = vector.shape_cast %10 : vector<2x16xf32> to vector<1x2x16xf32>
    tpu.vector_store %arg4[%c0_7, %c0_8, %c0_9], %13 {strides = array<i32>} : memref<1x2x16xf32, #tpu.memory_space<vmem>>, vector<1x2x16xf32>,
    return
  }
  func.func @transform_0(%arg0: i32) -> (i32, i32) {
    %c0_i32 = arith.constant 0 : i32
    %c0_i32_0 = arith.constant 0 : i32
    return %arg0, %c0_i32 : i32, i32
  }
  func.func @transform_1(%arg0: i32) -> (i32, i32) {
    %c0_i32 = arith.constant 0 : i32
    %c0_i32_0 = arith.constant 0 : i32
    %c0_i32_1 = arith.constant 0 : i32
    return %c0_i32, %c0_i32_0 : i32, i32
  }
  func.func @transform_2(%arg0: i32) -> (i32, i32) {
    %c0_i32 = arith.constant 0 : i32
    %c0_i32_0 = arith.constant 0 : i32
    return %arg0, %c0_i32 : i32, i32
  }
  func.func @transform_3(%arg0: i32) -> (i32, i32, i32) {
    %c0_i32 = arith.constant 0 : i32
    %c0_i32_0 = arith.constant 0 : i32
    %c0_i32_1 = arith.constant 0 : i32
    return %arg0, %c0_i32, %c0_i32_0 : i32, i32, i32
  }
}

</mosaic_0001>

<bundles_post_ra>
// kernel: tpu_custom_call.1
= control target key start
LH: loop header
LB: loop body
LE: loop exit
PB: predicated region body
PF: predicated region fallthrough
CT: control target
= control target key end

     0   :  { %vm135_vm0 = vcmask 130048   ;;  %s1294_s0 = inlined_call_operand.vmem [shape: bf16[256,16], index: 0, kind: input, shape index: {}]   ;;  %s1295_s1 = inlined_call_operand.vmem [shape: bf16[16,16], index: 1, kind: input, shape index: {}]   ;;  %s1296_s2 = inlined_call_operand.vmem [shape: bf16[256,16], index: 2, kind: output, shape index: {0}]   ;;  %s1297_s3 = inlined_call_operand.hbm [shape: f32[1,2,16], index: 3, kind: output, shape index: {1}]  }
   0x1   :  { %v849_v0 = vld [vmem:[%s1295_s1] sm:$0xff]   ;;  %v851_v2 = vld [vmem:[%s1294_s0 + $0x8] sm:$0xff]   ;;  %v852_v3 = vld [vmem:[%s1294_s0 + $0x10] sm:$0xff]  }
   0x2   :  { %v850_v1 = vld [vmem:[%s1294_s0] sm:$0xff]   ;;  %812 = vmatprep.subr.bf16.mxu0 %v849_v0  ;;  %846 = vmatprep.subr.bf16.mxu1 %v849_v0  ;;  %v853_v4 = vld [vmem:[%s1294_s0 + $0x18] sm:$0xff]   ;;  %v859_v7 = vld [vmem:[%s1294_s0 + $0x48] sm:$0xff]  }
   0x3   :  { %813 = vmatpush3.bf16.msra.mxu0 %v849_v0  ;;  %814 = vmatprep.mubr.msk.bf16.mxu0 %vm135_vm0, %v850_v1  ;;  %v854_v5 = vld [vmem:[%s1294_s0 + $0x20] sm:$0xff]   ;;  %v860_v8 = vld [vmem:[%s1294_s0 + $0x50] sm:$0xff]   ;;  %v861_v9 = vld [vmem:[%s1294_s0 + $0x58] sm:$0xff]  }
   0x4   :  { %847 = vmatpush3.bf16.msra.mxu1 %v849_v0  ;;  %v858_v6 = vld [vmem:[%s1294_s0 + $0x40] sm:$0xff]  }
   0x5   :  { %830 = vmatprep.mubr.msk.bf16.mxu1 %vm135_vm0, %v858_v6  ;;  %v862_v10 = vld [vmem:[%s1294_s0 + $0x60] sm:$0xff]  }
   0x6   :  { %815 = vmatmul.mubr.msk.bf16.vlgmr.msra.gmra.mrb[0].mxu0 %vm135_vm0, %v851_v2 }
   0x7   :  { %818 = vmatprep.mubr.msk.bf16.mxu0 %vm135_vm0, %v852_v3  ;;  %831 = vmatmul.mubr.msk.bf16.vlgmr.msra.gmra.mrb[0].mxu1 %vm135_vm0, %v859_v7 }
   0x8   :  { %834 = vmatprep.mubr.msk.bf16.mxu1 %vm135_vm0, %v860_v8 }
   0xe   :  { %819 = vmatmul.mubr.msk.bf16.gmra.mrb[4].mxu0 %vm135_vm0, %v853_v4 }
   0xf   :  { %822 = vmatprep.mubr.msk.bf16.mxu0 %vm135_vm0, %v854_v5 }
  0x10   :  { %9 = vsyncpa [#allocation3], 0  ;;  %v855_v11 = vld [vmem:[%s1294_s0 + $0x28] sm:$0xff]   ;;  %v856_v12 = vld [vmem:[%s1294_s0 + $0x30] sm:$0xff]   ;;  %835 = vmatmul.mubr.msk.bf16.gmra.mrb[4].mxu1 %vm135_vm0, %v861_v9  ;;  %vm473_vm1 = vcmask 125952   ;;  %vm676_vm2 = vcmask 1040384  }
  0x11   :  { %838 = vmatprep.mubr.msk.bf16.mxu1 %vm135_vm0, %v862_v10  ;;  %v863_v13 = vld [vmem:[%s1294_s0 + $0x68] sm:$0xff]   ;;  %v864_v14 = vld [vmem:[%s1294_s0 + $0x70] sm:$0xff]   ;;  %v857_v15 = vld [vmem:[%s1294_s0 + $0x38] sm:$0xff]   ;;  %vm678_vm3 = vcmask 123904  }
  0x12   :  { %v865_v16 = vld [vmem:[%s1294_s0 + $0x78] sm:$0xff]  }
  0x16   :  { %823 = vmatmul.mubr.msk.bf16.gmra.mrb[8].mxu0 %vm135_vm0, %v855_v11 }
  0x17   :  { %826 = vmatprep.mubr.msk.bf16.mxu0 %vm135_vm0, %v856_v12 }
  0x18   :  { %839 = vmatmul.mubr.msk.bf16.gmra.mrb[8].mxu1 %vm135_vm0, %v863_v13 }
  0x19   :  { %842 = vmatprep.mubr.msk.bf16.mxu1 %vm135_vm0, %v864_v14 }
  0x1e   :  { %827 = vmatmul.mubr.msk.bf16.gmra.mrb[12].mxu0 %vm135_vm0, %v857_v15 }
  0x20   :  { %843 = vmatmul.mubr.msk.bf16.gmra.mrb[12].mxu1 %vm135_vm0, %v865_v16 }
  0xd9   :  { %v816_v17 = vpop.f32.mrb[0].mxu0 }
  0xda   :  { %v765_v18 = vpack.c.bf16 %v816_v17, %v816_v17  ;;  %v218_v19 = vpop.f32.mrb[1].mxu0  ;;  %v577_v23 = vmul.f32 %v816_v17, %v816_v17  ;;  %v509_v32 = vsel %vm135_vm0, %v816_v17, 0.0  ;;  %v999_v35 = vpop.f32.mrb[0].mxu1 }
  0xdb   :  { %v763_v20 = vpack.c.bf16 %v218_v19, %v218_v19  ;;  %v575_v21 = vmul.f32 %v218_v19, %v218_v19  ;;  %v817_v22 = vpop.f32.mrb[2].mxu0  ;;  %v506_v26 = vsel %vm135_vm0, %v218_v19, 0.0  ;;  %v781_v38 = vpack.c.bf16 %v999_v35, %v999_v35  ;;  %v1003_v39 = vpop.f32.mrb[1].mxu1 }
  0xdc   :  { %476 = vst.msk [vmem:[%s1296_s2 + $0x8] sm:$0xf] %vm473_vm1, %v765_v18  ;;  %v766_v24 = vpack.c.bf16 %v817_v22, %v817_v22  ;;  %v221_v25 = vpop.f32.mrb[3].mxu0  ;;  %v578_v30 = vmul.f32 %v817_v22, %v817_v22  ;;  %v610_v40 = vsel %vm135_vm0, %v577_v23, 0.0  ;;  %v779_v42 = vpack.c.bf16 %v1003_v39, %v1003_v39  ;;  %v1008_v43 = vpop.f32.mrb[2].mxu1 }
  0xdd   :  { %474 = vst.msk [vmem:[%s1296_s2] sm:$0xf] %vm473_vm1, %v763_v20  ;;  %v764_v27 = vpack.c.bf16 %v221_v25, %v221_v25  ;;  %v507_v28 = vsel %vm135_vm0, %v221_v25, 0.0  ;;  %v576_v29 = vmul.f32 %v221_v25, %v221_v25  ;;  %v607_v33 = vsel %vm135_vm0, %v575_v21, 0.0  ;;  %492 = vst.msk [vmem:[%s1296_s2 + $0x48] sm:$0xf] %vm473_vm1, %v781_v38 }
  0xde   :  { %477 = vst.msk [vmem:[%s1296_s2 + $0xc] sm:$0xf] %vm473_vm1, %v766_v24  ;;  %v508_v31 = vadd.f32 %v507_v28, %v506_v26  ;;  %v511_v44 = vsel %vm135_vm0, %v817_v22, 0.0  ;;  %v612_v45 = vsel %vm135_vm0, %v578_v30, 0.0  ;;  %v1016_v49 = vpop.f32.mrb[3].mxu1  ;;  %v782_v2 = vpack.c.bf16 %v1008_v43, %v1008_v43 }
  0xdf   :  { %475 = vst.msk [vmem:[%s1296_s2 + $0x4] sm:$0xf] %vm473_vm1, %v764_v27  ;;  %v608_v34 = vsel %vm135_vm0, %v576_v29, 0.0  ;;  %490 = vst.msk [vmem:[%s1296_s2 + $0x40] sm:$0xf] %vm473_vm1, %v779_v42  ;;  %v780_v7 = vpack.c.bf16 %v1016_v49, %v1016_v49 }
  0xe0   :  { %v510_v36 = vadd.f32 %v509_v32, %v508_v31  ;;  %v609_v37 = vadd.f32 %v608_v34, %v607_v33  ;;  %493 = vst.msk [vmem:[%s1296_s2 + $0x4c] sm:$0xf] %vm473_vm1, %v782_v2 }
  0xe1   :  { %v820_v41 = vpop.f32.mrb[4].mxu0  ;;  %491 = vst.msk [vmem:[%s1296_s2 + $0x44] sm:$0xf] %vm473_vm1, %v780_v7 }
  0xe2   :  { %v611_v46 = vadd.f32 %v610_v40, %v609_v37  ;;  %v769_v47 = vpack.c.bf16 %v820_v41, %v820_v41  ;;  %v234_v48 = vpop.f32.mrb[5].mxu0  ;;  %v512_v51 = vadd.f32 %v511_v44, %v510_v36  ;;  %v581_v61 = vmul.f32 %v820_v41, %v820_v41 }
  0xe3   :  { %v767_v50 = vpack.c.bf16 %v234_v48, %v234_v48  ;;  %v513_v52 = vsel %vm135_vm0, %v234_v48, 0.0  ;;  %v579_v53 = vmul.f32 %v234_v48, %v234_v48  ;;  %v821_v54 = vpop.f32.mrb[6].mxu0  ;;  %v1043_v3 = vpop.f32.mrb[4].mxu1  ;;  %v517_v4 = vsel %vm135_vm0, %v820_v41, 0.0 }
  0xe4   :  { %480 = vst.msk [vmem:[%s1296_s2 + $0x18] sm:$0xf] %vm473_vm1, %v769_v47  ;;  %v613_v55 = vadd.f32 %v612_v45, %v611_v46  ;;  %v770_v56 = vpack.c.bf16 %v821_v54, %v821_v54  ;;  %v237_v57 = vpop.f32.mrb[7].mxu0  ;;  %v514_v58 = vadd.f32 %v513_v52, %v512_v51  ;;  %v582_v5 = vmul.f32 %v821_v54, %v821_v54  ;;  %v1049_v8 = vpop.f32.mrb[5].mxu1 }
  0xe5   :  { %478 = vst.msk [vmem:[%s1296_s2 + $0x10] sm:$0xf] %vm473_vm1, %v767_v50  ;;  %v614_v59 = vsel %vm135_vm0, %v579_v53, 0.0  ;;  %v768_v60 = vpack.c.bf16 %v237_v57, %v237_v57  ;;  %v515_v63 = vsel %vm135_vm0, %v237_v57, 0.0  ;;  %v580_v0 = vmul.f32 %v237_v57, %v237_v57  ;;  %v1055_v12 = vpop.f32.mrb[6].mxu1 }
  0xe6   :  { %v615_v62 = vadd.f32 %v614_v59, %v613_v55  ;;  %481 = vst.msk [vmem:[%s1296_s2 + $0x1c] sm:$0xf] %vm473_vm1, %v770_v56  ;;  %v516_v1 = vadd.f32 %v515_v63, %v514_v58  ;;  %v618_v13 = vsel %vm135_vm0, %v581_v61, 0.0  ;;  %v519_v14 = vsel %vm135_vm0, %v821_v54, 0.0  ;;  %v1063_v17 = vpop.f32.mrb[7].mxu1 }
  0xe7   :  { %479 = vst.msk [vmem:[%s1296_s2 + $0x14] sm:$0xf] %vm473_vm1, %v768_v60  ;;  %v616_v6 = vsel %vm135_vm0, %v580_v0, 0.0  ;;  %v620_v23 = vsel %vm135_vm0, %v582_v5, 0.0  ;;  %v785_v37 = vpack.c.bf16 %v1043_v3, %v1043_v3  ;;  %v783_v44 = vpack.c.bf16 %v1049_v8, %v1049_v8 }
  0xe8   :  { %v518_v9 = vadd.f32 %v517_v4, %v516_v1  ;;  %v617_v10 = vadd.f32 %v616_v6, %v615_v62 }
  0xe9   :  { %v824_v11 = vpop.f32.mrb[8].mxu0  ;;  %496 = vst.msk [vmem:[%s1296_s2 + $0x58] sm:$0xf] %vm473_vm1, %v785_v37  ;;  %494 = vst.msk [vmem:[%s1296_s2 + $0x50] sm:$0xf] %vm473_vm1, %v783_v44 }
  0xea   :  { %v773_v15 = vpack.c.bf16 %v824_v11, %v824_v11  ;;  %v250_v16 = vpop.f32.mrb[9].mxu0  ;;  %v619_v18 = vadd.f32 %v618_v13, %v617_v10  ;;  %v520_v20 = vadd.f32 %v519_v14, %v518_v9  ;;  %v585_v30 = vmul.f32 %v824_v11, %v824_v11 }
  0xeb   :  { %v771_v19 = vpack.c.bf16 %v250_v16, %v250_v16  ;;  %v521_v21 = vsel %vm135_vm0, %v250_v16, 0.0  ;;  %v825_v22 = vpop.f32.mrb[10].mxu0  ;;  %v583_v24 = vmul.f32 %v250_v16, %v250_v16  ;;  %v1087_v38 = vpop.f32.mrb[8].mxu1  ;;  %v525_v40 = vsel %vm135_vm0, %v824_v11, 0.0 }
  0xec   :  { %484 = vst.msk [vmem:[%s1296_s2 + $0x28] sm:$0xf] %vm473_vm1, %v773_v15  ;;  %v774_v25 = vpack.c.bf16 %v825_v22, %v825_v22  ;;  %v253_v26 = vpop.f32.mrb[11].mxu0  ;;  %v522_v27 = vadd.f32 %v521_v21, %v520_v20  ;;  %v621_v28 = vadd.f32 %v620_v23, %v619_v18  ;;  %v586_v41 = vmul.f32 %v825_v22, %v825_v22  ;;  %v1093_v45 = vpop.f32.mrb[9].mxu1 }
  0xed   :  { %482 = vst.msk [vmem:[%s1296_s2 + $0x20] sm:$0xf] %vm473_vm1, %v771_v19  ;;  %v772_v29 = vpack.c.bf16 %v253_v26, %v253_v26  ;;  %v622_v31 = vsel %vm135_vm0, %v583_v24, 0.0  ;;  %v523_v32 = vsel %vm135_vm0, %v253_v26, 0.0  ;;  %v584_v33 = vmul.f32 %v253_v26, %v253_v26  ;;  %v1099_v50 = vpop.f32.mrb[10].mxu1 }
  0xee   :  { %485 = vst.msk [vmem:[%s1296_s2 + $0x2c] sm:$0xf] %vm473_vm1, %v774_v25  ;;  %v623_v34 = vadd.f32 %v622_v31, %v621_v28  ;;  %v524_v36 = vadd.f32 %v523_v32, %v522_v27  ;;  %v626_v51 = vsel %vm135_vm0, %v585_v30, 0.0  ;;  %v527_v52 = vsel %vm135_vm0, %v825_v22, 0.0  ;;  %v1107_v55 = vpop.f32.mrb[11].mxu1 }
  0xef   :  { %483 = vst.msk [vmem:[%s1296_s2 + $0x24] sm:$0xf] %vm473_vm1, %v772_v29  ;;  %v624_v42 = vsel %vm135_vm0, %v584_v33, 0.0  ;;  %v628_v61 = vsel %vm135_vm0, %v586_v41, 0.0  ;;  %v591_v13 = vmul.f32 %v1003_v39, %v1003_v39  ;;  %v786_v14 = vpack.c.bf16 %v1055_v12, %v1055_v12 }
  0xf0   :  { %v526_v46 = vadd.f32 %v525_v40, %v524_v36  ;;  %v625_v47 = vadd.f32 %v624_v42, %v623_v34  ;;  %v784_v20 = vpack.c.bf16 %v1063_v17, %v1063_v17  ;;  %v537_v27 = vsel %vm135_vm0, %v1003_v39, 0.0 }
  0xf1   :  { %v828_v48 = vpop.f32.mrb[12].mxu0  ;;  %497 = vst.msk [vmem:[%s1296_s2 + $0x5c] sm:$0xf] %vm473_vm1, %v786_v14  ;;  %v789_v28 = vpack.c.bf16 %v1087_v38, %v1087_v38  ;;  %v787_v32 = vpack.c.bf16 %v1093_v45, %v1093_v45  ;;  %v638_v34 = vsel %vm135_vm0, %v591_v13, 0.0  ;;  %v592_v39 = vmul.f32 %v1016_v49, %v1016_v49 }
  0xf2   :  { %v777_v53 = vpack.c.bf16 %v828_v48, %v828_v48  ;;  %v266_v54 = vpop.f32.mrb[13].mxu0  ;;  %v627_v56 = vadd.f32 %v626_v51, %v625_v47  ;;  %v528_v58 = vadd.f32 %v527_v52, %v526_v46  ;;  %v589_v5 = vmul.f32 %v828_v48, %v828_v48  ;;  %495 = vst.msk [vmem:[%s1296_s2 + $0x54] sm:$0xf] %vm473_vm1, %v784_v20 }
  0xf3   :  { %v775_v57 = vpack.c.bf16 %v266_v54, %v266_v54  ;;  %v529_v59 = vsel %vm135_vm0, %v266_v54, 0.0  ;;  %v829_v60 = vpop.f32.mrb[14].mxu0  ;;  %v587_v62 = vmul.f32 %v266_v54, %v266_v54  ;;  %v1133_v15 = vpop.f32.mrb[12].mxu1  ;;  %v533_v16 = vsel %vm135_vm0, %v828_v48, 0.0  ;;  %500 = vst.msk [vmem:[%s1296_s2 + $0x68] sm:$0xf] %vm473_vm1, %v789_v28 }
  0xf4   :  { %488 = vst.msk [vmem:[%s1296_s2 + $0x38] sm:$0xf] %vm473_vm1, %v777_v53  ;;  %v778_v63 = vpack.c.bf16 %v829_v60, %v829_v60  ;;  %v269_v0 = vpop.f32.mrb[15].mxu0  ;;  %v530_v1 = vadd.f32 %v529_v59, %v528_v58  ;;  %v629_v2 = vadd.f32 %v628_v61, %v627_v56  ;;  %v590_v18 = vmul.f32 %v829_v60, %v829_v60  ;;  %v1139_v21 = vpop.f32.mrb[13].mxu1 }
  0xf5   :  { %486 = vst.msk [vmem:[%s1296_s2 + $0x30] sm:$0xf] %vm473_vm1, %v775_v57  ;;  %v776_v4 = vpack.c.bf16 %v269_v0, %v269_v0  ;;  %v630_v6 = vsel %vm135_vm0, %v587_v62, 0.0  ;;  %v531_v7 = vsel %vm135_vm0, %v269_v0, 0.0  ;;  %v588_v9 = vmul.f32 %v269_v0, %v269_v0  ;;  %v1145_v24 = vpop.f32.mrb[14].mxu1 }
  0xf6   :  { %489 = vst.msk [vmem:[%s1296_s2 + $0x3c] sm:$0xf] %vm473_vm1, %v778_v63  ;;  %v631_v10 = vadd.f32 %v630_v6, %v629_v2  ;;  %v532_v11 = vadd.f32 %v531_v7, %v530_v1  ;;  %v634_v25 = vsel %vm135_vm0, %v589_v5, 0.0  ;;  %v535_v26 = vsel %vm135_vm0, %v829_v60, 0.0  ;;  %v1157_v29 = vpop.f32.mrb[15].mxu1 }
  0xf7   :  { %487 = vst.msk [vmem:[%s1296_s2 + $0x34] sm:$0xf] %vm473_vm1, %v776_v4  ;;  %v632_v19 = vsel %vm135_vm0, %v588_v9, 0.0  ;;  %v636_v33 = vsel %vm135_vm0, %v590_v18, 0.0  ;;  %v790_v36 = vpack.c.bf16 %v1099_v50, %v1099_v50  ;;  %498 = vst.msk [vmem:[%s1296_s2 + $0x60] sm:$0xf] %vm473_vm1, %v787_v32  ;;  %v593_v41 = vmul.f32 %v999_v35, %v999_v35 }
  0xf8   :  { %v534_v22 = vadd.f32 %v533_v16, %v532_v11  ;;  %v633_v23 = vadd.f32 %v632_v19, %v631_v10  ;;  %v539_v42 = vsel %vm135_vm0, %v1016_v49, 0.0  ;;  %v788_v44 = vpack.c.bf16 %v1107_v55, %v1107_v55 }
  0xf9   :  { %501 = vst.msk [vmem:[%s1296_s2 + $0x6c] sm:$0xf] %vm473_vm1, %v790_v36  ;;  %v541_v46 = vsel %vm135_vm0, %v999_v35, 0.0  ;;  %v793_v51 = vpack.c.bf16 %v1133_v15, %v1133_v15  ;;  %v594_v52 = vmul.f32 %v1008_v43, %v1008_v43  ;;  %v640_v49 = vsel %vm135_vm0, %v592_v39, 0.0 }
  0xfa   :  { %v635_v30 = vadd.f32 %v634_v25, %v633_v23  ;;  %v536_v31 = vadd.f32 %v535_v26, %v534_v22  ;;  %v595_v53 = vmul.f32 %v1049_v8, %v1049_v8  ;;  %499 = vst.msk [vmem:[%s1296_s2 + $0x64] sm:$0xf] %vm473_vm1, %v788_v44  ;;  %v791_v35 = vpack.c.bf16 %v1139_v21, %v1139_v21 }
  0xfb   :  { %504 = vst.msk [vmem:[%s1296_s2 + $0x78] sm:$0xf] %vm473_vm1, %v793_v51  ;;  %v642_v57 = vsel %vm135_vm0, %v593_v41, 0.0  ;;  %v543_v58 = vsel %vm135_vm0, %v1008_v43, 0.0  ;;  %v545_v59 = vsel %vm135_vm0, %v1049_v8, 0.0  ;;  %v794_v60 = vpack.c.bf16 %v1145_v24, %v1145_v24 }
  0xfc   :  { %v538_v37 = vadd.f32 %v537_v27, %v536_v31  ;;  %v637_v40 = vadd.f32 %v636_v33, %v635_v30  ;;  %502 = vst.msk [vmem:[%s1296_s2 + $0x70] sm:$0xf] %vm473_vm1, %v791_v35  ;;  %v792_v63 = vpack.c.bf16 %v1157_v29, %v1157_v29  ;;  %v644_v0 = vsel %vm135_vm0, %v594_v52, 0.0 }
  0xfd   :  { %v646_v43 = vsel %vm135_vm0, %v595_v53, 0.0  ;;  %v596_v8 = vmul.f32 %v1063_v17, %v1063_v17  ;;  %505 = vst.msk [vmem:[%s1296_s2 + $0x7c] sm:$0xf] %vm473_vm1, %v794_v60  ;;  %v597_v4 = vmul.f32 %v1043_v3, %v1043_v3  ;;  %v547_v5 = vsel %vm135_vm0, %v1063_v17, 0.0 }
  0xfe   :  { %v639_v47 = vadd.f32 %v638_v34, %v637_v40  ;;  %v540_v48 = vadd.f32 %v539_v42, %v538_v37  ;;  %503 = vst.msk [vmem:[%s1296_s2 + $0x74] sm:$0xf] %vm473_vm1, %v792_v63  ;;  %v549_v9 = vsel %vm135_vm0, %v1043_v3, 0.0  ;;  %v598_v10 = vmul.f32 %v1055_v12, %v1055_v12  ;;  %s890_s2 = smov [#allocation2]  }
  0xff   :  { %v648_v11 = vsel %vm135_vm0, %v596_v8, 0.0  ;;  %v599_v13 = vmul.f32 %v1093_v45, %v1093_v45  ;;  %v650_v18 = vsel %vm135_vm0, %v597_v4, 0.0  ;;  %v551_v17 = vsel %vm135_vm0, %v1055_v12, 0.0  ;;  %s688_s22 = sshll.u32 %s890_s2, 4  ;;  %s689_s22 = int_to_ptr.vmem [resolvable:$true] %s688_s22 }
 0x100   :  { %v542_v54 = vadd.f32 %v541_v46, %v540_v48  ;;  %v641_v56 = vadd.f32 %v640_v49, %v639_v47  ;;  %v553_v19 = vsel %vm135_vm0, %v1093_v45, 0.0  ;;  %v652_v22 = vsel %vm135_vm0, %v598_v10, 0.0  ;;  %s866_s23 = scalar_lea.vmem %s689_s22, 32  ;;  %p871_p1 = scmp.lt.s32.totalorder %s689_s22, %s689_s22 }
 0x101   :  { %v654_v23 = vsel %vm135_vm0, %v599_v13, 0.0  ;;  %v600_v25 = vmul.f32 %v1107_v55, %v1107_v55  ;;  %v601_v28 = vmul.f32 %v1087_v38, %v1087_v38  ;;  %v555_v12 = vsel %vm135_vm0, %v1107_v55, 0.0  ;;  %p867_p0 = scmp.ne.s32.totalorder %s689_s22, %s866_s23  ;;  %p872_p2 = scmp.lt.s32.totalorder %s866_s23, %s866_s23 }
 0x102   :  { %v643_v61 = vadd.f32 %v642_v57, %v641_v56  ;;  %v544_v62 = vadd.f32 %v543_v58, %v542_v54  ;;  %v557_v45 = vsel %vm135_vm0, %v1087_v38, 0.0  ;;  %v602_v32 = vmul.f32 %v1099_v50, %v1099_v50 }
 0x103   :  { %v656_v33 = vsel %vm135_vm0, %v600_v25, 0.0  ;;  %v603_v34 = vmul.f32 %v1139_v21, %v1139_v21  ;;  %v658_v37 = vsel %vm135_vm0, %v601_v28, 0.0  ;;  %v559_v55 = vsel %vm135_vm0, %v1099_v50, 0.0  ;;  %p873_p3 = por %p872_p2, %p871_p1 }
 0x104   :  { %v546_v1 = vadd.f32 %v545_v59, %v544_v62  ;;  %v645_v2 = vadd.f32 %v644_v0, %v643_v61  ;;  %v561_v40 = vsel %vm135_vm0, %v1139_v21, 0.0  ;;  %v660_v42 = vsel %vm135_vm0, %v602_v32, 0.0 }
 0x105   :  { %v662_v44 = vsel %vm135_vm0, %v603_v34, 0.0  ;;  %v604_v46 = vmul.f32 %v1157_v29, %v1157_v29  ;;  %v605_v51 = vmul.f32 %v1133_v15, %v1133_v15  ;;  %v563_v50 = vsel %vm135_vm0, %v1157_v29, 0.0  ;;  %p874_p4 = pnand %p873_p3, %p867_p0 }
 0x106   :  { %v647_v6 = vadd.f32 %v646_v43, %v645_v2  ;;  %v548_v7 = vadd.f32 %v547_v5, %v546_v1  ;;  %v565_v21 = vsel %vm135_vm0, %v1133_v15, 0.0  ;;  %v606_v53 = vmul.f32 %v1145_v24, %v1145_v24 }
 0x107   :  { %v664_v35 = vsel %vm135_vm0, %v604_v46, 0.0  ;;  %v666_v57 = vsel %vm135_vm0, %v605_v51, 0.0  ;;  %v567_v58 = vsel %vm135_vm0, %v1145_v24, 0.0 }
 0x108   :  { %v550_v14 = vadd.f32 %v549_v9, %v548_v7  ;;  %v649_v16 = vadd.f32 %v648_v11, %v647_v6  ;;  %v668_v29 = vsel %vm135_vm0, %v606_v53, 0.0 }
 0x10a   :  { %v651_v20 = vadd.f32 %v650_v18, %v649_v16  ;;  %v552_v3 = vadd.f32 %v551_v17, %v550_v14 }
 0x10c   :  { %v554_v26 = vadd.f32 %v553_v19, %v552_v3  ;;  %v653_v27 = vadd.f32 %v652_v22, %v651_v20 }
 0x10e   :  { %v655_v30 = vadd.f32 %v654_v23, %v653_v27  ;;  %v556_v31 = vadd.f32 %v555_v12, %v554_v26 }
 0x110   :  { %v558_v39 = vadd.f32 %v557_v45, %v556_v31  ;;  %v657_v36 = vadd.f32 %v656_v33, %v655_v30 }
 0x112   :  { %v659_v41 = vadd.f32 %v658_v37, %v657_v36  ;;  %v560_v38 = vadd.f32 %v559_v55, %v558_v39 }
 0x114   :  { %v562_v47 = vadd.f32 %v561_v40, %v560_v38  ;;  %v661_v48 = vadd.f32 %v660_v42, %v659_v41 }
 0x116   :  { %v663_v52 = vadd.f32 %v662_v44, %v661_v48  ;;  %v564_v49 = vadd.f32 %v563_v50, %v562_v47 }
 0x118   :  { %v566_v54 = vadd.f32 %v565_v21, %v564_v49  ;;  %v665_v56 = vadd.f32 %v664_v35, %v663_v52 }
 0x11a   :  { %v568_v59 = vadd.f32 %v567_v58, %v566_v54  ;;  %v667_v60 = vadd.f32 %v666_v57, %v665_v56 }
 0x11c   :  { %v569_v61 = vrot.slane %v568_v59, 4  ;;  %v669_v62 = vadd.f32 %v668_v29, %v667_v60 }
 0x11e   :  { %v570_v63 = vadd.f32 %v569_v61, %v568_v59  ;;  %v670_v15 = vrot.slane %v669_v62, 4 }
 0x120   :  { %v571_v0 = vrot.slane %v570_v63, 2  ;;  %v671_v43 = vadd.f32 %v670_v15, %v669_v62 }
 0x122   :  { %v572_v8 = vadd.f32 %v571_v0, %v570_v63  ;;  %v672_v1 = vrot.slane %v671_v43, 2 }
 0x124   :  { %v573_v2 = vrot.slane %v572_v8, 1  ;;  %v673_v4 = vadd.f32 %v672_v1, %v671_v43 }
 0x126   :  { %v674_v5 = vrot.slane %v673_v4, 1  ;;  %v574_v6 = vadd.f32 %v573_v2, %v572_v8 }
 0x128   :  { %v675_v24 = vadd.f32 %v674_v5, %v673_v4 }
 0x12a   :  { %v677_v7 = vsel %vm676_vm2, %v574_v6, %v675_v24 }
 0x12b   :  { %679 = vst.msk [vmem:[#allocation2] sm:$0x3] %vm678_vm3, %v677_v7 }
 0x12c   :  { %877 = shalt.err (!%p874_p4)
}
 0x12d   :  { %s878_s26 = scalar_lea.hbm %s1297_s3, 32 }
 0x12e   :  { %p879_p5 = scmp.ne.s32.totalorder %s1297_s3, %s878_s26  ;;  %p882_p6 = scmp.lt.u32.totalorder %s878_s26, %s1297_s3 }
 0x130   :  { %p884_p7 = pnand %p882_p6, %p879_p5 }
 0x132   :  { %887 = shalt.err (!%p884_p7)
}
 0x133   :  { %691 = dma.vmem_to_hbm [thread:$0]  %s689_s22, 32, %s1297_s3, [#allocation3]  }
 0x134   :  { %888 = dma.done.wait [#allocation3], 32  }
 0x135   :  { %889 = vsyncadd [#allocation3], 4294967264 }
 0x136   :  { %697 = vsyncpa [#allocation3], 1 }

</bundles_post_ra>
